<compile_context>
chip_gen: v7x
topology: tpu7x:2x2x1
jax: 0.10.0
libtpu: 0.0.40
codegen_flags: <defaults>
</compile_context>

<pallas_src>
import functools

import jax
import jax.numpy as jnp
from jax.experimental import pallas as pl
from jax.experimental.pallas import tpu as pltpu


def _round_up(x, m):
    return ((x + m - 1) // m) * m


def ppd_kernel(logits_ref, target_ref, out_ref, sum_acc, cnt_acc, *,
               ignore_label, n_rows, steps_per_core):
    c = pl.program_id(0)          # core-split axis ("parallel")
    i = pl.program_id(1)          # row-tile axis ("arbitrary", accumulated)

    @pl.when(i == 0)
    def _():
        sum_acc[...] = jnp.zeros_like(sum_acc)
        cnt_acc[...] = jnp.zeros_like(cnt_acc)

    logits = logits_ref[...].astype(jnp.float32)      # (tn, C)
    tgt = target_ref[...]                             # (tn, 1) int32
    tn, C = logits.shape

    # Logical (unclamped) tile index -> global row ids.  The index_map clamps
    # the DMA'd block to stay in-bounds; duplicated / past-the-end tiles are
    # killed here by the row mask so they contribute exactly zero.
    tile = c * steps_per_core + i
    row = jax.lax.broadcasted_iota(jnp.int32, (tn, 1), 0) + tile * tn
    col = jax.lax.broadcasted_iota(jnp.int32, (tn, C), 1)

    # One "true" per valid in-range row (one-hot of the target class).
    mask = (col == tgt) & (tgt != ignore_label) & (row < n_rows)   # (tn, C)

    sq = (1.0 - logits) ** 2                          # lane-dense (tn, C)
    msq = jnp.where(mask, sq, 0.0)
    mcnt = mask.astype(jnp.float32)

    # Partial reduce to (8, C): split the sublane axis into groups of 8 and
    # sum over the group axis -> pure VPU adds, no per-step XLU lane reduce.
    sum_acc[...] += jnp.sum(msq.reshape(tn // 8, 8, C), axis=0)
    cnt_acc[...] += jnp.sum(mcnt.reshape(tn // 8, 8, C), axis=0)

    # Write the fused partial slab once, on the last row-tile of this split.
    @pl.when(i == pl.num_programs(1) - 1)
    def _():
        out_ref[0] = sum_acc[...]
        out_ref[1] = cnt_acc[...]


def ppd_loss(contrast_logits, contrast_target, *, ignore_label=-1,
             tn=None, num_core_splits=2):
    """contrast_logits: (N, C) float32/bfloat16, contrast_target: (N,) int."""
    N, C = contrast_logits.shape
    target_2d = contrast_target.reshape(N, 1).astype(jnp.int32)

    # Auto-pick a bandwidth-friendly row tile (~2 MiB of lane-padded logits
    # per block; double-buffered by the pipeline -> ~4 MiB of VMEM).
    cpad = _round_up(C, 128)
    bytes_per_row = cpad * contrast_logits.dtype.itemsize
    if tn is None:
        tn = max(8, min(8192, (2 * 1024 * 1024) // bytes_per_row))
    tn = min(tn, _round_up(N, 8))
    tn = max(8, (tn // 8) * 8)

    num_tiles = pl.cdiv(N, tn)
    ncores = max(1, min(num_core_splits, num_tiles))
    spc = pl.cdiv(num_tiles, ncores)          # row tiles per core split

    def row_block_map(c, i):
        # Clamp so no DMA starts past the array end; the kernel masks using
        # the logical (unclamped) tile index, so clamped duplicates add zero.
        return (jnp.minimum(c * spc + i, num_tiles - 1), 0)

    out = pl.pallas_call(
        functools.partial(ppd_kernel, ignore_label=ignore_label,
                          n_rows=N, steps_per_core=spc),
        out_shape=jax.ShapeDtypeStruct((ncores, 2, 8, C), jnp.float32),
        grid_spec=pltpu.PrefetchScalarGridSpec(
            num_scalar_prefetch=0,
            grid=(ncores, spc),
            in_specs=[
                pl.BlockSpec((tn, C), row_block_map),
                pl.BlockSpec((tn, 1), row_block_map),
            ],
            out_specs=pl.BlockSpec((None, 2, 8, C), lambda c, i: (c, 0, 0, 0)),
            scratch_shapes=[
                pltpu.VMEM((8, C), jnp.float32),   # sum partials
                pltpu.VMEM((8, C), jnp.float32),   # count partials
            ],
        ),
        compiler_params=pltpu.CompilerParams(
            dimension_semantics=("parallel", "arbitrary"),
        ),
    )(contrast_logits, target_2d)

    sums = jnp.sum(out[:, 0])
    cnts = jnp.sum(out[:, 1])
    # Mean over valid rows (NaN if no valid rows, matching torch .mean() on empty).
    return sums / cnts


def ppd_loss_reference(contrast_logits, contrast_target, ignore_label=-1):
    valid = contrast_target != ignore_label
    idx = jnp.clip(contrast_target, 0, contrast_logits.shape[1] - 1).astype(jnp.int32)
    gathered = jnp.take_along_axis(contrast_logits, idx[:, None], axis=1)[:, 0]
    sq = (1.0 - gathered) ** 2
    return jnp.sum(jnp.where(valid, sq, 0.0)) / jnp.sum(valid.astype(jnp.float32))


if __name__ == "__main__":
    key = jax.random.PRNGKey(0)
    k1, k2, k3 = jax.random.split(key, 3)

    N, C = 300, 32          # N flattened pixels (not a multiple of 8), C prototypes
    ignore_label = -1

    contrast_logits = jax.random.normal(k1, (N, C), dtype=jnp.float32)
    raw_target = jax.random.randint(k2, (N,), 0, C, dtype=jnp.int32)
    drop = jax.random.bernoulli(k3, p=0.25, shape=(N,))
    contrast_target = jnp.where(drop, jnp.int32(ignore_label), raw_target)

    ref = ppd_loss_reference(contrast_logits, contrast_target, ignore_label)

    # Default (auto) tiling: single large tile covering all rows.
    loss = ppd_loss(contrast_logits, contrast_target, ignore_label=ignore_label)
    loss = jax.block_until_ready(loss)
    assert jnp.allclose(loss, ref, rtol=1e-5, atol=1e-6), (loss, ref)

    # Small tiles to exercise the multi-tile, ragged-tail and core-split paths.
    loss_tiled = ppd_loss(contrast_logits, contrast_target,
                          ignore_label=ignore_label, tn=64, num_core_splits=2)
    loss_tiled = jax.block_until_ready(loss_tiled)
    assert jnp.allclose(loss_tiled, ref, rtol=1e-5, atol=1e-6), (loss_tiled, ref)

    print("KERNEL_OK")
</pallas_src>

<mosaic_0001>
module attributes {stable_mosaic.version = 11 : i64} {
  func.func @ppd_kernel(%arg0: i32, %arg1: i32, %arg2: memref<304x32xf32, #tpu.memory_space<vmem>>, %arg3: memref<304x1xi32, #tpu.memory_space<vmem>>, %arg4: memref<1x2x8x32xf32, #tpu.memory_space<vmem>>, %arg5: memref<8x32xf32, #tpu.memory_space<vmem>>, %arg6: memref<8x32xf32, #tpu.memory_space<vmem>>) attributes {dimension_semantics = [#tpu.dimension_semantics<parallel>, #tpu.dimension_semantics<arbitrary>], iteration_bounds = array<i64: 1, 1>, scalar_prefetch = 0 : i64, scratch_operands = 2 : i64, tpu.core_type = #tpu.core_type<tc>, window_params = [{transform_indices = @transform_0, window_bounds = array<i64: 304, 32>}, {transform_indices = @transform_1, window_bounds = array<i64: 304, 1>}, {transform_indices = @transform_2, window_bounds = array<i64: 1, 2, 8, 32>}]} {
    %c0_i32 = arith.constant 0 : i32
    %0 = arith.cmpi eq, %arg1, %c0_i32 : i32
    %1 = arith.extui %0 : i1 to i32
    %c0_i32_0 = arith.constant 0 : i32
    %2 = arith.cmpi ne, %1, %c0_i32_0 : i32
    scf.if %2 {
      %cst_17 = arith.constant 0.000000e+00 : f32
      %42 = vector.broadcast %cst_17 : f32 to vector<8x32xf32>
      %c0_18 = arith.constant 0 : index
      %c0_19 = arith.constant 0 : index
      %43 = vector.load %arg5[%c0_18, %c0_19] : memref<8x32xf32, #tpu.memory_space<vmem>>, vector<8x32xf32>
      tpu.vector_store %arg5[%c0_18, %c0_19], %42 {strides = array<i32>} : memref<8x32xf32, #tpu.memory_space<vmem>>, vector<8x32xf32>,
      %cst_20 = arith.constant 0.000000e+00 : f32
      %44 = vector.broadcast %cst_20 : f32 to vector<8x32xf32>
      %c0_21 = arith.constant 0 : index
      %c0_22 = arith.constant 0 : index
      %45 = vector.load %arg6[%c0_21, %c0_22] : memref<8x32xf32, #tpu.memory_space<vmem>>, vector<8x32xf32>
      tpu.vector_store %arg6[%c0_21, %c0_22], %44 {strides = array<i32>} : memref<8x32xf32, #tpu.memory_space<vmem>>, vector<8x32xf32>,
    } else {
    }
    %c0 = arith.constant 0 : index
    %c0_1 = arith.constant 0 : index
    %3 = vector.load %arg2[%c0, %c0_1] : memref<304x32xf32, #tpu.memory_space<vmem>>, vector<304x32xf32>
    %c0_2 = arith.constant 0 : index
    %c0_3 = arith.constant 0 : index
    %4 = vector.load %arg3[%c0_2, %c0_3] : memref<304x1xi32, #tpu.memory_space<vmem>>, vector<304x1xi32>
    %c1_i32 = arith.constant 1 : i32
    %5 = arith.muli %arg0, %c1_i32 : i32
    %6 = arith.addi %5, %arg1 : i32
    %7 = tpu.iota {dimensions = array<i32: 0>} : vector<304x1xi32>
    %c304_i32 = arith.constant 304 : i32
    %8 = arith.muli %6, %c304_i32 : i32
    %9 = vector.broadcast %8 : i32 to vector<304x1xi32>
    %10 = arith.addi %7, %9 : vector<304x1xi32>
    %11 = tpu.iota {dimensions = array<i32: 1>} : vector<304x32xi32>
    %12 = vector.broadcast %4 : vector<304x1xi32> to vector<304x32xi32>
    %13 = arith.cmpi eq, %11, %12 : vector<304x32xi32>
    %c-1_i32 = arith.constant -1 : i32
    %14 = vector.broadcast %c-1_i32 : i32 to vector<304x1xi32>
    %15 = arith.cmpi ne, %4, %14 : vector<304x1xi32>
    %16 = vector.broadcast %15 : vector<304x1xi1> to vector<304x32xi1>
    %17 = arith.andi %13, %16 : vector<304x32xi1>
    %c300_i32 = arith.constant 300 : i32
    %18 = vector.broadcast %c300_i32 : i32 to vector<304x1xi32>
    %19 = arith.cmpi slt, %10, %18 : vector<304x1xi32>
    %20 = vector.broadcast %19 : vector<304x1xi1> to vector<304x32xi1>
    %21 = arith.andi %17, %20 : vector<304x32xi1>
    %cst = arith.constant 1.000000e+00 : f32
    %22 = vector.broadcast %cst : f32 to vector<304x32xf32>
    %23 = arith.subf %22, %3 : vector<304x32xf32>
    %24 = arith.mulf %23, %23 : vector<304x32xf32>
    %cst_4 = arith.constant 0.000000e+00 : f32
    %25 = vector.broadcast %cst_4 : f32 to vector<304x32xf32>
    %26 = arith.select %21, %24, %25 : vector<304x32xi1>, vector<304x32xf32>
    %27 = arith.extui %21 : vector<304x32xi1> to vector<304x32xi32>
    %28 = arith.sitofp %27 : vector<304x32xi32> to vector<304x32xf32>
    %c0_5 = arith.constant 0 : index
    %c0_6 = arith.constant 0 : index
    %29 = vector.load %arg5[%c0_5, %c0_6] : memref<8x32xf32, #tpu.memory_space<vmem>>, vector<8x32xf32>
    %30 = vector.shape_cast %26 : vector<304x32xf32> to vector<38x8x32xf32>
    %cst_7 = arith.constant dense<0.000000e+00> : vector<8x32xf32>
    %31 = vector.multi_reduction <add>, %30, %cst_7 [0] : vector<38x8x32xf32> to vector<8x32xf32>
    %32 = arith.addf %29, %31 : vector<8x32xf32>
    %c0_8 = arith.constant 0 : index
    %c0_9 = arith.constant 0 : index
    %33 = vector.load %arg5[%c0_8, %c0_9] : memref<8x32xf32, #tpu.memory_space<vmem>>, vector<8x32xf32>
    tpu.vector_store %arg5[%c0_8, %c0_9], %32 {strides = array<i32>} : memref<8x32xf32, #tpu.memory_space<vmem>>, vector<8x32xf32>,
    %c0_10 = arith.constant 0 : index
    %c0_11 = arith.constant 0 : index
    %34 = vector.load %arg6[%c0_10, %c0_11] : memref<8x32xf32, #tpu.memory_space<vmem>>, vector<8x32xf32>
    %35 = vector.shape_cast %28 : vector<304x32xf32> to vector<38x8x32xf32>
    %cst_12 = arith.constant dense<0.000000e+00> : vector<8x32xf32>
    %36 = vector.multi_reduction <add>, %35, %cst_12 [0] : vector<38x8x32xf32> to vector<8x32xf32>
    %37 = arith.addf %34, %36 : vector<8x32xf32>
    %c0_13 = arith.constant 0 : index
    %c0_14 = arith.constant 0 : index
    %38 = vector.load %arg6[%c0_13, %c0_14] : memref<8x32xf32, #tpu.memory_space<vmem>>, vector<8x32xf32>
    tpu.vector_store %arg6[%c0_13, %c0_14], %37 {strides = array<i32>} : memref<8x32xf32, #tpu.memory_space<vmem>>, vector<8x32xf32>,
    %c0_i32_15 = arith.constant 0 : i32
    %39 = arith.cmpi eq, %arg1, %c0_i32_15 : i32
    %40 = arith.extui %39 : i1 to i32
    %c0_i32_16 = arith.constant 0 : i32
    %41 = arith.cmpi ne, %40, %c0_i32_16 : i32
    scf.if %41 {
      %c0_17 = arith.constant 0 : index
      %c0_18 = arith.constant 0 : index
      %42 = vector.load %arg5[%c0_17, %c0_18] : memref<8x32xf32, #tpu.memory_space<vmem>>, vector<8x32xf32>
      %c0_19 = arith.constant 0 : index
      %c0_20 = arith.constant 0 : index
      %c0_21 = arith.constant 0 : index
      %c0_22 = arith.constant 0 : index
      %43 = vector.load %arg4[%c0_19, %c0_20, %c0_21, %c0_22] : memref<1x2x8x32xf32, #tpu.memory_space<vmem>>, vector<1x1x8x32xf32>
      %44 = vector.shape_cast %43 : vector<1x1x8x32xf32> to vector<8x32xf32>
      %45 = vector.shape_cast %42 : vector<8x32xf32> to vector<1x1x8x32xf32>
      tpu.vector_store %arg4[%c0_19, %c0_20, %c0_21, %c0_22], %45 {strides = array<i32>} : memref<1x2x8x32xf32, #tpu.memory_space<vmem>>, vector<1x1x8x32xf32>,
      %c0_23 = arith.constant 0 : index
      %c0_24 = arith.constant 0 : index
      %46 = vector.load %arg6[%c0_23, %c0_24] : memref<8x32xf32, #tpu.memory_space<vmem>>, vector<8x32xf32>
      %c0_25 = arith.constant 0 : index
      %c1 = arith.constant 1 : index
      %c0_26 = arith.constant 0 : index
      %c0_27 = arith.constant 0 : index
      %47 = vector.load %arg4[%c0_25, %c1, %c0_26, %c0_27] : memref<1x2x8x32xf32, #tpu.memory_space<vmem>>, vector<1x1x8x32xf32>
      %48 = vector.shape_cast %47 : vector<1x1x8x32xf32> to vector<8x32xf32>
      %49 = vector.shape_cast %46 : vector<8x32xf32> to vector<1x1x8x32xf32>
      tpu.vector_store %arg4[%c0_25, %c1, %c0_26, %c0_27], %49 {strides = array<i32>} : memref<1x2x8x32xf32, #tpu.memory_space<vmem>>, vector<1x1x8x32xf32>,
    } else {
    }
    return
  }
  func.func @transform_0(%arg0: i32, %arg1: i32) -> (i32, i32) {
    %c1_i32 = arith.constant 1 : i32
    %0 = arith.muli %arg0, %c1_i32 : i32
    %1 = arith.addi %0, %arg1 : i32
    %c0_i32 = arith.constant 0 : i32
    %2 = arith.minsi %1, %c0_i32 : i32
    %c0_i32_0 = arith.constant 0 : i32
    %c0_i32_1 = arith.constant 0 : i32
    return %2, %c0_i32_0 : i32, i32
  }
  func.func @transform_1(%arg0: i32, %arg1: i32) -> (i32, i32) {
    %c1_i32 = arith.constant 1 : i32
    %0 = arith.muli %arg0, %c1_i32 : i32
    %1 = arith.addi %0, %arg1 : i32
    %c0_i32 = arith.constant 0 : i32
    %2 = arith.minsi %1, %c0_i32 : i32
    %c0_i32_0 = arith.constant 0 : i32
    %c0_i32_1 = arith.constant 0 : i32
    return %2, %c0_i32_0 : i32, i32
  }
  func.func @transform_2(%arg0: i32, %arg1: i32) -> (i32, i32, i32, i32) {
    %c0_i32 = arith.constant 0 : i32
    %c0_i32_0 = arith.constant 0 : i32
    %c0_i32_1 = arith.constant 0 : i32
    %c0_i32_2 = arith.constant 0 : i32
    return %arg0, %c0_i32, %c0_i32_0, %c0_i32_1 : i32, i32, i32, i32
  }
}

</mosaic_0001>

<bundles_post_ra>
// kernel: tpu_custom_call.1
= control target key start
LH: loop header
LB: loop body
LE: loop exit
PB: predicated region body
PF: predicated region fallthrough
CT: control target
= control target key end

     0   :  { %v1263_v3 = vmov 0   ;;  %s2389_s0 = inlined_call_operand.vmem [shape: f32[300,32], index: 0, kind: input, shape index: {}]   ;;  %s2390_s1 = inlined_call_operand.vmem [shape: s32[300,1], index: 1, kind: input, shape index: {}]   ;;  %s2391_s2 = inlined_call_operand.hbm [shape: f32[1,2,8,32], index: 2, kind: output, shape index: {}]  }
   0x1   :  { %v123_v0 = vld [vmem:[%s2390_s1 + $0x10] sm:$0xff]  ;;  %v121_v1 = vld [vmem:[%s2390_s1] sm:$0xff]  ;;  %v124_v2 = vld [vmem:[%s2390_s1 + $0x18] sm:$0xff]  ;;  %1238 = vset.pattern.permute.xlu1 %v1263_v3  ;;  %1237 = vset.pattern.permute.xlu0 %v1263_v3 }
   0x2   :  { %vm395_vm0 = vcmp.ne.s32.totalorder %v123_v0, 4294967295  ;;  %vm393_vm1 = vcmp.ne.s32.totalorder %v121_v1, 4294967295  ;;  %v122_v4 = vld [vmem:[%s2390_s1 + $0x8] sm:$0xff]  ;;  %vm396_vm2 = vcmp.ne.s32.totalorder %v124_v2, 4294967295  ;;  %248 = vperm.xlu1 %1238, %v123_v0   ;;  %242 = vperm.xlu0 %1237, %v121_v1   ;;  %v125_v8 = vld [vmem:[%s2390_s1 + $0x20] sm:$0xff]  ;;  %v128_v9 = vld [vmem:[%s2390_s1 + $0x38] sm:$0xff] }
   0x3   :  { %v126_v5 = vld [vmem:[%s2390_s1 + $0x28] sm:$0xff]  ;;  %vm394_vm3 = vcmp.ne.s32.totalorder %v122_v4, 4294967295  ;;  %v1301_v6 = vsel %vm393_vm1, 1, %v1263_v3  ;;  %v1304_v7 = vsel %vm396_vm2, 1, %v1263_v3  ;;  %v1316_v11 = vsel %vm395_vm0, 1, %v1263_v3  ;;  %v127_v12 = vld [vmem:[%s2390_s1 + $0x30] sm:$0xff] }
   0x4   :  { %v1313_v10 = vsel %vm394_vm3, 1, %v1263_v3  ;;  %vm398_vm4 = vcmp.ne.s32.totalorder %v126_v5, 4294967295  ;;  %vm397_vm5 = vcmp.ne.s32.totalorder %v125_v8, 4294967295  ;;  %vm400_vm6 = vcmp.ne.s32.totalorder %v128_v9, 4294967295  ;;  %v1327_v14 = vld [vmem:[%s2390_s1 + $0x48] sm:$0xff]  ;;  %v1332_v15 = vld [vmem:[%s2390_s1 + $0x40] sm:$0xff] }
   0x5   :  { %v1322_v13 = vsel %vm398_vm4, 1, %v1263_v3  ;;  %v1335_v16 = vsel %vm397_vm5, 1, %v1263_v3  ;;  %v1338_v17 = vsel %vm400_vm6, 1, %v1263_v3  ;;  %vm399_vm7 = vcmp.ne.s32.totalorder %v127_v12, 4294967295  ;;  %v1343_v18 = vld [vmem:[%s2390_s1 + $0x58] sm:$0xff]  ;;  %v1353_v20 = vld [vmem:[%s2390_s1 + $0x50] sm:$0xff] }
   0x6   :  { %251 = vperm.xlu1 %1238, %v124_v2   ;;  %245 = vperm.xlu0 %1237, %v122_v4   ;;  %v1346_v19 = vsel %vm399_vm7, 1, %v1263_v3  ;;  %vm402_vm8 = vcmp.ne.s32.totalorder %v1327_v14, 4294967295  ;;  %vm401_vm9 = vcmp.ne.s32.totalorder %v1332_v15, 4294967295  ;;  %v1358_v21 = vld [vmem:[%s2390_s1 + $0x68] sm:$0xff]  ;;  %vm404_vm10 = vcmp.ne.s32.totalorder %v1343_v18, 4294967295  ;;  %v1370_v24 = vld [vmem:[%s2390_s1 + $0x60] sm:$0xff] }
   0x7   :  { %v1361_v22 = vsel %vm402_vm8, 1, %v1263_v3  ;;  %v1364_v23 = vsel %vm401_vm9, 1, %v1263_v3  ;;  %v1373_v25 = vsel %vm404_vm10, 1, %v1263_v3  ;;  %vm403_vm11 = vcmp.ne.s32.totalorder %v1353_v20, 4294967295  ;;  %v1380_v26 = vld [vmem:[%s2390_s1 + $0x78] sm:$0xff]  ;;  %v1385_v27 = vld [vmem:[%s2390_s1 + $0x70] sm:$0xff] }
   0x8   :  { %vm406_vm12 = vcmp.ne.s32.totalorder %v1358_v21, 4294967295  ;;  %v1388_v28 = vsel %vm403_vm11, 1, %v1263_v3  ;;  %vm405_vm13 = vcmp.ne.s32.totalorder %v1370_v24, 4294967295  ;;  %v1397_v30 = vld [vmem:[%s2390_s1 + $0x88] sm:$0xff]  ;;  %v1402_v31 = vld [vmem:[%s2390_s1 + $0x80] sm:$0xff]  ;;  %v1407_v32 = vld [vmem:[%s2390_s1 + $0x98] sm:$0xff] }
   0x9   :  { %v1391_v29 = vsel %vm406_vm12, 1, %v1263_v3  ;;  %v1410_v33 = vsel %vm405_vm13, 1, %v1263_v3  ;;  %vm408_vm14 = vcmp.ne.s32.totalorder %v1380_v26, 4294967295  ;;  %vm407_vm15 = vcmp.ne.s32.totalorder %v1385_v27, 4294967295  ;;  %v1417_v34 = vld [vmem:[%s2390_s1 + $0x90] sm:$0xff]  ;;  %v1422_v35 = vld [vmem:[%s2390_s1 + $0xa8] sm:$0xff] }
   0xa   :  { %257 = vperm.xlu1 %1238, %v126_v5   ;;  %254 = vperm.xlu0 %1237, %v125_v8   ;;  %v1427_v36 = vld [vmem:[%s2390_s1 + $0xa0] sm:$0xff]  ;;  %v1430_v37 = vsel %vm408_vm14, 1, %v1263_v3  ;;  %v1433_v38 = vsel %vm407_vm15, 1, %v1263_v3  ;;  %vm410_vm0 = vcmp.ne.s32.totalorder %v1397_v30, 4294967295  ;;  %v1439_v39 = vld [vmem:[%s2390_s1 + $0xb8] sm:$0xff]  ;;  %v1444_v40 = vld [vmem:[%s2390_s1 + $0xb0] sm:$0xff] }
   0xb   :  { %v1447_v41 = vsel %vm410_vm0, 1, %v1263_v3  ;;  %vm409_vm1 = vcmp.ne.s32.totalorder %v1402_v31, 4294967295  ;;  %vm412_vm2 = vcmp.ne.s32.totalorder %v1407_v32, 4294967295  ;;  %vm411_vm3 = vcmp.ne.s32.totalorder %v1417_v34, 4294967295 }
   0xc   :  { %v1453_v42 = vsel %vm409_vm1, 1, %v1263_v3  ;;  %v1456_v43 = vsel %vm412_vm2, 1, %v1263_v3  ;;  %v1459_v44 = vsel %vm411_vm3, 1, %v1263_v3  ;;  %vm414_vm4 = vcmp.ne.s32.totalorder %v1422_v35, 4294967295 }
   0xd   :  { %7 = vsyncpa [#allocation5], 0  ;;  %v1465_v45 = vld [vmem:[%s2390_s1 + $0xc8] sm:$0xff]  ;;  %v1468_v46 = vsel %vm414_vm4, 1, %v1263_v3  ;;  %vm413_vm5 = vcmp.ne.s32.totalorder %v1427_v36, 4294967295  ;;  %vm416_vm6 = vcmp.ne.s32.totalorder %v1439_v39, 4294967295 }
   0xe   :  { %263 = vperm.xlu1 %1238, %v128_v9   ;;  %260 = vperm.xlu0 %1237, %v127_v12   ;;  %vm415_vm7 = vcmp.ne.s32.totalorder %v1444_v40, 4294967295  ;;  %v145_v47 = vld [vmem:[%s2390_s1 + $0xc0] sm:$0xff]  ;;  %v148_v48 = vld [vmem:[%s2390_s1 + $0xd8] sm:$0xff]  ;;  %v1480_v49 = vsel %vm413_vm5, 1, %v1263_v3  ;;  %v1483_v50 = vsel %vm416_vm6, 1, %v1263_v3  ;;  %vm418_vm8 = vcmp.ne.s32.totalorder %v1465_v45, 4294967295 }
   0xf   :  { %v1486_v51 = vsel %vm415_vm7, 1, %v1263_v3  ;;  %v147_v52 = vld [vmem:[%s2390_s1 + $0xd0] sm:$0xff]  ;;  %v150_v53 = vld [vmem:[%s2390_s1 + $0xe8] sm:$0xff]  ;;  %v1496_v54 = vsel %vm418_vm8, 1, %v1263_v3  ;;  %vm417_vm9 = vcmp.ne.s32.totalorder %v145_v47, 4294967295  ;;  %vm420_vm10 = vcmp.ne.s32.totalorder %v148_v48, 4294967295 }
  0x10   :  { %v149_v55 = vld [vmem:[%s2390_s1 + $0xe0] sm:$0xff]  ;;  %v152_v56 = vld [vmem:[%s2390_s1 + $0xf8] sm:$0xff]  ;;  %v1505_v57 = vsel %vm417_vm9, 1, %v1263_v3  ;;  %v1508_v58 = vsel %vm420_vm10, 1, %v1263_v3  ;;  %vm419_vm11 = vcmp.ne.s32.totalorder %v147_v52, 4294967295  ;;  %vm422_vm12 = vcmp.ne.s32.totalorder %v150_v53, 4294967295 }
  0x11   :  { %v151_v59 = vld [vmem:[%s2390_s1 + $0xf0] sm:$0xff]  ;;  %v154_v60 = vld [vmem:[%s2390_s1 + $0x108] sm:$0xff]  ;;  %v1519_v61 = vsel %vm419_vm11, 1, %v1263_v3  ;;  %v1522_v62 = vsel %vm422_vm12, 1, %v1263_v3  ;;  %vm421_vm13 = vcmp.ne.s32.totalorder %v149_v55, 4294967295  ;;  %vm424_vm14 = vcmp.ne.s32.totalorder %v152_v56, 4294967295 }
  0x12   :  { %269 = vperm.xlu1 %1238, %v1327_v14   ;;  %266 = vperm.xlu0 %1237, %v1332_v15   ;;  %v153_v63 = vld [vmem:[%s2390_s1 + $0x100] sm:$0xff]  ;;  %v156_v0 = vld [vmem:[%s2390_s1 + $0x118] sm:$0xff]  ;;  %v1531_v1 = vsel %vm421_vm13, 1, %v1263_v3  ;;  %v1534_v2 = vsel %vm424_vm14, 1, %v1263_v3  ;;  %vm423_vm15 = vcmp.ne.s32.totalorder %v151_v59, 4294967295  ;;  %vm426_vm0 = vcmp.ne.s32.totalorder %v154_v60, 4294967295 }
  0x13   :  { %2409 = vst [vmem:[#allocation7_spill] sm:$0xff] %v1534_v2  ;;  %v155_v4 = vld [vmem:[%s2390_s1 + $0x110] sm:$0xff]  ;;  %v158_v5 = vld [vmem:[%s2390_s1 + $0x128] sm:$0xff]  ;;  %v1543_v8 = vsel %vm423_vm15, 1, %v1263_v3  ;;  %v1546_v9 = vsel %vm426_vm0, 1, %v1263_v3  ;;  %vm425_vm1 = vcmp.ne.s32.totalorder %v153_v63, 4294967295 }
  0x14   :  { %2410 = vst [vmem:[#allocation8_spill] sm:$0xff] %v1543_v8  ;;  %2411 = vst [vmem:[#allocation9_spill] sm:$0xff] %v1546_v9  ;;  %vm428_vm2 = vcmp.ne.s32.totalorder %v156_v0, 4294967295  ;;  %v157_v12 = vld [vmem:[%s2390_s1 + $0x120] sm:$0xff]  ;;  %v1552_v14 = vsel %vm425_vm1, 1, %v1263_v3  ;;  %vm427_vm3 = vcmp.ne.s32.totalorder %v155_v4, 4294967295 }
  0x15   :  { %v1555_v15 = vsel %vm428_vm2, 1, %v1263_v3  ;;  %vm430_vm4 = vcmp.ne.s32.totalorder %v158_v5, 4294967295  ;;  %v1560_v9 = vsel %vm427_vm3, 1, %v1263_v3  ;;  %vm429_vm5 = vcmp.ne.s32.totalorder %v157_v12, 4294967295 }
  0x16   :  { %275 = vperm.xlu1 %1238, %v1343_v18   ;;  %272 = vperm.xlu0 %1237, %v1353_v20   ;;  %v1563_v8 = vsel %vm430_vm4, 1, %v1263_v3  ;;  %v1566_v2 = vsel %vm429_vm5, 1, %v1263_v3  ;;  %vm80_vm6 = vcmask 261120   ;;  %v2393_v3 = vmov 0.0  }
  0x17   :  { %81 = vst.msk [vmem:[#allocation2] sm:$0xff] %vm80_vm6, %v2393_v3  ;;  %82 = vst.msk [vmem:[#allocation3] sm:$0xff] %vm80_vm6, %v2393_v3 }
  0x1a   :  { %281 = vperm.xlu1 %1238, %v1358_v21   ;;  %278 = vperm.xlu0 %1237, %v1370_v24  }
  0x1b   :  { %v2413_v18 = vld [vmem:[#allocation8_spill] sm:$0xff]  ;;  %v2414_v21 = vld [vmem:[#allocation9_spill] sm:$0xff] }
  0x1e   :  { %287 = vperm.xlu1 %1238, %v1380_v26   ;;  %284 = vperm.xlu0 %1237, %v1385_v27  }
  0x22   :  { %293 = vperm.xlu1 %1238, %v1397_v30   ;;  %290 = vperm.xlu0 %1237, %v1402_v31  }
  0x26   :  { %299 = vperm.xlu1 %1238, %v1407_v32   ;;  %296 = vperm.xlu0 %1237, %v1417_v34  }
  0x2a   :  { %305 = vperm.xlu1 %1238, %v1422_v35   ;;  %302 = vperm.xlu0 %1237, %v1427_v36  }
  0x2e   :  { %311 = vperm.xlu1 %1238, %v1439_v39   ;;  %308 = vperm.xlu0 %1237, %v1444_v40  }
  0x32   :  { %317 = vperm.xlu1 %1238, %v1465_v45   ;;  %314 = vperm.xlu0 %1237, %v145_v47   ;;  %v83_v45 = vld [vmem:[%s2389_s0] sm:$0xff]  ;;  %v85_v47 = vld [vmem:[%s2389_s0 + $0x10] sm:$0xff] }
  0x36   :  { %323 = vperm.xlu1 %1238, %v148_v48   ;;  %320 = vperm.xlu0 %1237, %v147_v52   ;;  %v88_v48 = vld [vmem:[%s2389_s0 + $0x28] sm:$0xff] }
  0x3a   :  { %329 = vperm.xlu1 %1238, %v150_v53   ;;  %326 = vperm.xlu0 %1237, %v149_v55   ;;  %v89_v55 = vld [vmem:[%s2389_s0 + $0x30] sm:$0xff] }
  0x3e   :  { %335 = vperm.xlu1 %1238, %v152_v56   ;;  %332 = vperm.xlu0 %1237, %v151_v59   ;;  %v811_v56 = vsub.f32 1.0, %v83_v45  ;;  %v92_v59 = vld [vmem:[%s2389_s0 + $0x48] sm:$0xff] }
  0x42   :  { %341 = vperm.xlu1 %1238, %v154_v60   ;;  %338 = vperm.xlu0 %1237, %v153_v63   ;;  %v91_v60 = vld [vmem:[%s2389_s0 + $0x40] sm:$0xff]  ;;  %v94_v63 = vld [vmem:[%s2389_s0 + $0x58] sm:$0xff] }
  0x46   :  { %347 = vperm.xlu1 %1238, %v156_v0   ;;  %344 = vperm.xlu0 %1237, %v155_v4   ;;  %v96_v4 = vld [vmem:[%s2389_s0 + $0x68] sm:$0xff] }
  0x4a   :  { %353 = vperm.xlu1 %1238, %v158_v5   ;;  %350 = vperm.xlu0 %1237, %v157_v12  }
  0x4e   :  { %473 = vperm.xlu1 %1238, %v1313_v10   ;;  %470 = vperm.xlu0 %1237, %v1301_v6  }
  0x52   :  { %479 = vperm.xlu1 %1238, %v1304_v7   ;;  %476 = vperm.xlu0 %1237, %v1316_v11  }
  0x56   :  { %485 = vperm.xlu1 %1238, %v1322_v13   ;;  %482 = vperm.xlu0 %1237, %v1335_v16  }
  0x5a   :  { %491 = vperm.xlu1 %1238, %v1338_v17   ;;  %488 = vperm.xlu0 %1237, %v1346_v19   ;;  %v2412_v17 = vld [vmem:[#allocation7_spill] sm:$0xff] }
  0x5e   :  { %497 = vperm.xlu1 %1238, %v1361_v22   ;;  %494 = vperm.xlu0 %1237, %v1364_v23  }
  0x62   :  { %503 = vperm.xlu1 %1238, %v1373_v25   ;;  %500 = vperm.xlu0 %1237, %v1388_v28  }
  0x66   :  { %509 = vperm.xlu1 %1238, %v1391_v29   ;;  %506 = vperm.xlu0 %1237, %v1410_v33  }
  0x6a   :  { %515 = vperm.xlu1 %1238, %v1430_v37   ;;  %512 = vperm.xlu0 %1237, %v1433_v38  }
  0x6e   :  { %521 = vperm.xlu1 %1238, %v1447_v41   ;;  %518 = vperm.xlu0 %1237, %v1453_v42  }
  0x72   :  { %527 = vperm.xlu1 %1238, %v1456_v43   ;;  %524 = vperm.xlu0 %1237, %v1459_v44   ;;  %v84_v44 = vld [vmem:[%s2389_s0 + $0x8] sm:$0xff] }
  0x73   :  { %v812_v53 = vsub.f32 1.0, %v84_v44 }
  0x75   :  { %v1733_v12 = vmul.f32 %v812_v53, %v812_v53 }
  0x76   :  { %533 = vperm.xlu1 %1238, %v1468_v46   ;;  %530 = vperm.xlu0 %1237, %v1480_v49   ;;  %v86_v46 = vld [vmem:[%s2389_s0 + $0x18] sm:$0xff]  ;;  %v87_v49 = vld [vmem:[%s2389_s0 + $0x20] sm:$0xff] }
  0x7a   :  { %539 = vperm.xlu1 %1238, %v1483_v50   ;;  %536 = vperm.xlu0 %1237, %v1486_v51   ;;  %v2392_v50 = vlaneseq }
  0x7c   :  { %v1727_v5 = vand.u32 127, %v2392_v50 }
  0x7e   :  { %545 = vperm.xlu1 %1238, %v1496_v54   ;;  %542 = vperm.xlu0 %1237, %v1505_v57   ;;  %v90_v54 = vld [vmem:[%s2389_s0 + $0x38] sm:$0xff]  ;;  %v814_v57 = vsub.f32 1.0, %v86_v46  ;;  %v822_v46 = vsub.f32 1.0, %v94_v63  ;;  %v104_v63 = vld [vmem:[%s2389_s0 + $0xa8] sm:$0xff] }
  0x7f   :  { %v818_v0 = vsub.f32 1.0, %v90_v54 }
  0x80   :  { %v1743_v44 = vmul.f32 %v814_v57, %v814_v57  ;;  %v102_v57 = vld [vmem:[%s2389_s0 + $0x98] sm:$0xff] }
  0x81   :  { %v1611_v6 = vpop.permute.xlu1 %248  ;;  %v1613_v7 = vpop.permute.xlu0 %242 }
  0x82   :  { %551 = vperm.xlu1 %1238, %v1508_v58   ;;  %548 = vperm.xlu0 %1237, %v1519_v61   ;;  %v813_v58 = vsub.f32 1.0, %v85_v47  ;;  %v816_v61 = vsub.f32 1.0, %v88_v48  ;;  %v97_v47 = vld [vmem:[%s2389_s0 + $0x70] sm:$0xff]  ;;  %v100_v48 = vld [vmem:[%s2389_s0 + $0x88] sm:$0xff]  ;;  %vm357_vm7 = vcmp.eq.s32.totalorder %v1727_v5, %v1611_v6  ;;  %vm355_vm8 = vcmp.eq.s32.totalorder %v1727_v5, %v1613_v7  ;;  %v118_v6 = vld [vmem:[%s2389_s0 + $0x118] sm:$0xff] }
  0x84   :  { %v1745_v45 = vmul.f32 %v813_v58, %v813_v58  ;;  %v101_v58 = vld [vmem:[%s2389_s0 + $0x90] sm:$0xff] }
  0x85   :  { %v1617_v10 = vpop.permute.xlu1 %251  ;;  %v1619_v11 = vpop.permute.xlu0 %245 }
  0x86   :  { %557 = vperm.xlu1 %1238, %v1522_v62   ;;  %554 = vperm.xlu0 %1237, %v1531_v1   ;;  %v815_v62 = vsub.f32 1.0, %v87_v49  ;;  %v817_v1 = vsub.f32 1.0, %v89_v55  ;;  %v1753_v49 = vmul.f32 %v816_v61, %v816_v61  ;;  %v824_v55 = vsub.f32 1.0, %v96_v4 }
  0x87   :  { %vm358_vm9 = vcmp.eq.s32.totalorder %v1727_v5, %v1617_v10  ;;  %vm356_vm10 = vcmp.eq.s32.totalorder %v1727_v5, %v1619_v11 }
  0x88   :  { %v1755_v53 = vmul.f32 %v815_v62, %v815_v62 }
  0x89   :  { %v1623_v13 = vpop.permute.xlu1 %257  ;;  %v1625_v16 = vpop.permute.xlu0 %254 }
  0x8a   :  { %563 = vperm.xlu1 %1238, %v2412_v17   ;;  %560 = vperm.xlu0 %1237, %v2413_v18   ;;  %v95_v17 = vld [vmem:[%s2389_s0 + $0x60] sm:$0xff]  ;;  %v98_v18 = vld [vmem:[%s2389_s0 + $0x78] sm:$0xff]  ;;  %vm360_vm13 = vcmp.eq.s32.totalorder %v1727_v5, %v1623_v13  ;;  %vm359_vm14 = vcmp.eq.s32.totalorder %v1727_v5, %v1625_v16  ;;  %v2439_v13 = vlaneseq }
  0x8b   :  { %v823_v61 = vsub.f32 1.0, %v95_v17  ;;  %v826_v62 = vsub.f32 1.0, %v98_v18  ;;  %v106_v17 = vld [vmem:[%s2389_s0 + $0xb8] sm:$0xff]  ;;  %v105_v18 = vld [vmem:[%s2389_s0 + $0xb0] sm:$0xff] }
  0x8d   :  { %v1629_v19 = vpop.permute.xlu1 %263  ;;  %v1631_v20 = vpop.permute.xlu0 %260 }
  0x8e   :  { %569 = vperm.xlu1 %1238, %v2414_v21   ;;  %566 = vperm.xlu0 %1237, %v1552_v14   ;;  %v820_v14 = vsub.f32 1.0, %v92_v59  ;;  %v1741_v21 = vmul.f32 %v811_v56, %v811_v56  ;;  %v99_v56 = vld [vmem:[%s2389_s0 + $0x80] sm:$0xff]  ;;  %v1766_v59 = vmul.f32 %v818_v0, %v818_v0  ;;  %vm362_vm4 = vcmp.eq.s32.totalorder %v1727_v5, %v1629_v19 }
  0x8f   :  { %vm361_vm5 = vcmp.eq.s32.totalorder %v1727_v5, %v1631_v20  ;;  %v1985_v20 = vld [vmem:[%s2389_s0 + $0x128] sm:$0xff] }
  0x90   :  { %v1780_v3 = vmul.f32 %v820_v14, %v820_v14  ;;  %v108_v14 = vld [vmem:[%s2389_s0 + $0xc8] sm:$0xff] }
  0x91   :  { %v1635_v22 = vpop.permute.xlu1 %269  ;;  %v1637_v23 = vpop.permute.xlu0 %266 }
  0x92   :  { %575 = vperm.xlu1 %1238, %v1555_v15   ;;  %572 = vperm.xlu0 %1237, %v1560_v9   ;;  %v819_v15 = vsub.f32 1.0, %v91_v60  ;;  %v1768_v60 = vmul.f32 %v817_v1, %v817_v1  ;;  %v825_v1 = vsub.f32 1.0, %v97_v47 }
  0x94   :  { %v1782_v0 = vmul.f32 %v819_v15, %v819_v15  ;;  %v107_v15 = vld [vmem:[%s2389_s0 + $0xc0] sm:$0xff] }
  0x95   :  { %v1641_v24 = vpop.permute.xlu1 %275  ;;  %v1643_v25 = vpop.permute.xlu0 %272 }
  0x96   :  { %581 = vperm.xlu1 %1238, %v1563_v8   ;;  %578 = vperm.xlu0 %1237, %v1566_v2   ;;  %v93_v2 = vld [vmem:[%s2389_s0 + $0x50] sm:$0xff] }
  0x97   :  { %v821_v54 = vsub.f32 1.0, %v93_v2  ;;  %v103_v2 = vld [vmem:[%s2389_s0 + $0xa0] sm:$0xff] }
  0x99   :  { %v1647_v26 = vpop.permute.xlu1 %281  ;;  %v1649_v27 = vpop.permute.xlu0 %278  ;;  %v1798_v47 = vmul.f32 %v821_v54, %v821_v54  ;;  %v112_v54 = vld [vmem:[%s2389_s0 + $0xe8] sm:$0xff] }
  0x9d   :  { %v1651_v28 = vpop.permute.xlu1 %287  ;;  %v1653_v29 = vpop.permute.xlu0 %284 }
  0xa1   :  { %v1655_v30 = vpop.permute.xlu1 %293  ;;  %v1657_v31 = vpop.permute.xlu0 %290 }
  0xa5   :  { %v1659_v32 = vpop.permute.xlu1 %299  ;;  %v1661_v33 = vpop.permute.xlu0 %296 }
  0xa9   :  { %v1663_v34 = vpop.permute.xlu1 %305  ;;  %v1665_v35 = vpop.permute.xlu0 %302 }
  0xad   :  { %v1667_v36 = vpop.permute.xlu1 %311  ;;  %v1669_v37 = vpop.permute.xlu0 %308 }
  0xae   :  { %2415 = vst [vmem:[#allocation7_spill] sm:$0xff] %v1669_v37 }
  0xb1   :  { %v1671_v38 = vpop.permute.xlu1 %317  ;;  %v1673_v39 = vpop.permute.xlu0 %314 }
  0xb2   :  { %2416 = vst [vmem:[#allocation8_spill] sm:$0xff] %v1671_v38  ;;  %2417 = vst [vmem:[#allocation9_spill] sm:$0xff] %v1673_v39 }
  0xb5   :  { %v1675_v40 = vpop.permute.xlu1 %323  ;;  %v1677_v41 = vpop.permute.xlu0 %320 }
  0xb6   :  { %2418 = vst [vmem:[#allocation10_spill] sm:$0xff] %v1675_v40  ;;  %2419 = vst [vmem:[#allocation11_spill] sm:$0xff] %v1677_v41  ;;  %v109_v41 = vld [vmem:[%s2389_s0 + $0xd0] sm:$0xff]  ;;  %v835_v40 = vsub.f32 1.0, %v107_v15 }
  0xb9   :  { %v1679_v42 = vpop.permute.xlu1 %329  ;;  %v1681_v43 = vpop.permute.xlu0 %326 }
  0xba   :  { %2420 = vst [vmem:[#allocation12_spill] sm:$0xff] %v1679_v42  ;;  %2421 = vst [vmem:[#allocation13_spill] sm:$0xff] %v1681_v43  ;;  %v831_v43 = vsub.f32 1.0, %v103_v2  ;;  %v833_v42 = vsub.f32 1.0, %v105_v18  ;;  %v1819_v2 = vmul.f32 %v825_v1, %v825_v1  ;;  %v837_v1 = vsub.f32 1.0, %v109_v41 }
  0xbb   :  { %v1848_v41 = vmul.f32 %v835_v40, %v835_v40 }
  0xbc   :  { %v1840_v15 = vmul.f32 %v833_v42, %v833_v42  ;;  %v1861_v40 = vmul.f32 %v837_v1, %v837_v1  ;;  %v116_v1 = vld [vmem:[%s2389_s0 + $0x108] sm:$0xff] }
  0xbd   :  { %v1701_v51 = vpop.permute.xlu1 %335  ;;  %v1703_v52 = vpop.permute.xlu0 %332 }
  0xbe   :  { %2422 = vst [vmem:[#allocation14_spill] sm:$0xff] %v1701_v51  ;;  %2423 = vst [vmem:[#allocation15_spill] sm:$0xff] %v1703_v52  ;;  %v827_v52 = vsub.f32 1.0, %v99_v56  ;;  %v829_v51 = vsub.f32 1.0, %v101_v58  ;;  %v1805_v56 = vmul.f32 %v823_v61, %v823_v61  ;;  %v834_v58 = vsub.f32 1.0, %v106_v17  ;;  %v111_v17 = vld [vmem:[%s2389_s0 + $0xe0] sm:$0xff] }
  0xbf   :  { %2431 = vst [vmem:[#allocation23_spill] sm:$0xff] %v1861_v40 }
  0xc0   :  { %v1826_v18 = vmul.f32 %v827_v52, %v827_v52  ;;  %v1830_v38 = vmul.f32 %v829_v51, %v829_v51  ;;  %v839_v52 = vsub.f32 1.0, %v111_v17  ;;  %v113_v17 = vld [vmem:[%s2389_s0 + $0xf0] sm:$0xff] }
  0xc1   :  { %v1729_v8 = vpop.permute.xlu1 %341  ;;  %v1731_v9 = vpop.permute.xlu0 %338 }
  0xc2   :  { %2424 = vst [vmem:[#allocation16_spill] sm:$0xff] %v1729_v8  ;;  %2425 = vst [vmem:[#allocation17_spill] sm:$0xff] %v1731_v9  ;;  %v828_v9 = vsub.f32 1.0, %v100_v48  ;;  %v1790_v8 = vmul.f32 %v822_v46, %v822_v46  ;;  %v1800_v48 = vmul.f32 %v824_v55, %v824_v55  ;;  %v110_v46 = vld [vmem:[%s2389_s0 + $0xd8] sm:$0xff]  ;;  %v1870_v11 = vmul.f32 %v839_v52, %v839_v52 }
  0xc3   :  { %v838_v37 = vsub.f32 1.0, %v110_v46 }
  0xc4   :  { %v1821_v61 = vmul.f32 %v828_v9, %v828_v9  ;;  %v840_v9 = vsub.f32 1.0, %v112_v54  ;;  %v2433_v54 = vmov 0.0   ;;  %2434 = vst [vmem:[#allocation25_spill] sm:$0xff] %v1870_v11 }
  0xc5   :  { %v1776_v4 = vpop.permute.xlu1 %347  ;;  %v1778_v50 = vpop.permute.xlu0 %344  ;;  %v1855_v42 = vmul.f32 %v838_v37, %v838_v37 }
  0xc6   :  { %2426 = vst [vmem:[#allocation18_spill] sm:$0xff] %v1776_v4  ;;  %2427 = vst [vmem:[#allocation19_spill] sm:$0xff] %v1778_v50  ;;  %v830_v4 = vsub.f32 1.0, %v102_v57  ;;  %v832_v50 = vsub.f32 1.0, %v104_v63  ;;  %v1807_v57 = vmul.f32 %v826_v62, %v826_v62  ;;  %v836_v62 = vsub.f32 1.0, %v108_v14 }
  0xc7   :  { %v1838_v14 = vmul.f32 %v834_v58, %v834_v58  ;;  %2430 = vst [vmem:[#allocation22_spill] sm:$0xff] %v1855_v42  ;;  %v1863_v46 = vmul.f32 %v840_v9, %v840_v9  ;;  %v844_v42 = vsub.f32 1.0, %v116_v1 }
  0xc8   :  { %v1828_v39 = vmul.f32 %v830_v4, %v830_v4  ;;  %v114_v4 = vld [vmem:[%s2389_s0 + $0xf8] sm:$0xff] }
  0xc9   :  { %v1815_v55 = vpop.permute.xlu1 %353  ;;  %v1817_v63 = vpop.permute.xlu0 %350  ;;  %2432 = vst [vmem:[#allocation24_spill] sm:$0xff] %v1863_v46  ;;  %v842_v37 = vsub.f32 1.0, %v114_v4  ;;  %v115_v4 = vld [vmem:[%s2389_s0 + $0x100] sm:$0xff] }
  0xca   :  { %2428 = vst [vmem:[#allocation20_spill] sm:$0xff] %v1815_v55  ;;  %2429 = vst [vmem:[#allocation21_spill] sm:$0xff] %v1817_v63  ;;  %v1832_v55 = vmul.f32 %v832_v50, %v832_v50  ;;  %v1834_v63 = vmul.f32 %v831_v43, %v831_v43  ;;  %v1846_v43 = vmul.f32 %v836_v62, %v836_v62 }
  0xcd   :  { %v474_v50 = vpop.permute.xlu1 %473  ;;  %v471_v51 = vpop.permute.xlu0 %470 }
  0xce   :  { %vm584_vm11 = vcmp.eq.s32.totalorder %v474_v50, 1  ;;  %vm583_vm12 = vcmp.eq.s32.totalorder %v471_v51, 1 }
  0xcf   :  { %vm622_vm15 = vmand %vm356_vm10, %vm584_vm11  ;;  %vm364_vm11 = vcmp.eq.s32.totalorder %v1727_v5, %v1635_v22 }
  0xd0   :  { %v888_v58 = vsel %vm622_vm15, %v1733_v12, 0.0  ;;  %v1195_v62 = vsel %vm622_vm15, 1.0, %v2433_v54  ;;  %vm621_vm0 = vmand %vm355_vm8, %vm583_vm12 }
  0xd1   :  { %v1004_v9 = vsel %vm80_vm6, %v888_v58, 0.0  ;;  %v1082_v12 = vsel %vm80_vm6, %v1195_v62, 0.0  ;;  %v887_v50 = vsel %vm621_vm0, %v1741_v21, 0.0  ;;  %v1194_v7 = vsel %vm621_vm0, 1.0, %v2433_v54  ;;  %v480_v51 = vpop.permute.xlu1 %479  ;;  %v477_v52 = vpop.permute.xlu0 %476 }
  0xd2   :  { %v1003_v11 = vsel %vm80_vm6, %v887_v50, 0.0  ;;  %v1081_v46 = vsel %vm80_vm6, %v1194_v7, 0.0  ;;  %vm586_vm1 = vcmp.eq.s32.totalorder %v480_v51, 1  ;;  %vm585_vm2 = vcmp.eq.s32.totalorder %v477_v52, 1 }
  0xd3   :  { %v1005_v40 = vadd.f32 %v1004_v9, %v1003_v11  ;;  %v1083_v58 = vadd.f32 %v1082_v12, %v1081_v46  ;;  %vm1890_vm3 = vmand %vm358_vm9, %vm586_vm1  ;;  %v841_v62 = vsub.f32 1.0, %v113_v17  ;;  %v1901_v46 = vmul.f32 %v842_v37, %v842_v37  ;;  %v117_v37 = vld [vmem:[%s2389_s0 + $0x110] sm:$0xff] }
  0xd4   :  { %vm623_vm8 = vmand %vm357_vm7, %vm585_vm2  ;;  %v843_v11 = vsub.f32 1.0, %v115_v4  ;;  %v890_v10 = vsel %vm1890_vm3, %v1743_v44, 0.0  ;;  %v1197_v17 = vsel %vm1890_vm3, 1.0, %v2433_v54  ;;  %v1928_v21 = vmul.f32 %v844_v42, %v844_v42 }
  0xd5   :  { %v889_v1 = vsel %vm623_vm8, %v1745_v45, 0.0  ;;  %v1196_v9 = vsel %vm623_vm8, 1.0, %v2433_v54  ;;  %v486_v12 = vpop.permute.xlu1 %485  ;;  %v483_v50 = vpop.permute.xlu0 %482  ;;  %v1926_v4 = vmul.f32 %v841_v62, %v841_v62  ;;  %v1008_v62 = vsel %vm80_vm6, %v890_v10, 0.0 }
  0xd6   :  { %v1006_v44 = vsel %vm80_vm6, %v889_v1, 0.0  ;;  %v1084_v7 = vsel %vm80_vm6, %v1196_v9, 0.0  ;;  %vm588_vm7 = vcmp.eq.s32.totalorder %v486_v12, 1  ;;  %vm587_vm9 = vcmp.eq.s32.totalorder %v483_v50, 1 }
  0xd7   :  { %v1007_v51 = vadd.f32 %v1006_v44, %v1005_v40  ;;  %v1085_v45 = vadd.f32 %v1084_v7, %v1083_v58  ;;  %vm1922_vm10 = vmand %vm360_vm13, %vm588_vm7  ;;  %v1935_v40 = vmul.f32 %v843_v11, %v843_v11  ;;  %v846_v58 = vsub.f32 1.0, %v118_v6 }
  0xd8   :  { %vm625_vm12 = vmand %vm359_vm14, %vm587_vm9  ;;  %v845_v1 = vsub.f32 1.0, %v117_v37  ;;  %v161_v9 = vshrl.u32 %v2439_v13, 7  ;;  %vm363_vm13 = vcmp.eq.s32.totalorder %v1727_v5, %v1637_v23  ;;  %v1086_v42 = vsel %vm80_vm6, %v1197_v17, 0.0  ;;  %v1949_v13 = vld [vmem:[%s2389_s0 + $0x120] sm:$0xff]  ;;  %s1265_s0 = smov [#allocation4]  }
  0xd9   :  { %v891_v12 = vsel %vm625_vm12, %v1755_v53, 0.0  ;;  %v1198_v50 = vsel %vm625_vm12, 1.0, %v2433_v54  ;;  %v492_v44 = vpop.permute.xlu1 %491  ;;  %v489_v16 = vpop.permute.xlu0 %488  ;;  %v1009_v7 = vadd.f32 %v1008_v62, %v1007_v51  ;;  %v1087_v6 = vadd.f32 %v1086_v42, %v1085_v45  ;;  %s1171_s18 = sshll.u32 %s1265_s0, 4  ;;  %s1172_s18 = int_to_ptr.vmem [resolvable:$true] %s1171_s18 }
  0xda   :  { %v1010_v11 = vsel %vm80_vm6, %v891_v12, 0.0  ;;  %v1088_v37 = vsel %vm80_vm6, %v1198_v50, 0.0  ;;  %v892_v10 = vsel %vm1922_vm10, %v1753_v49, 0.0  ;;  %v1199_v53 = vsel %vm1922_vm10, 1.0, %v2433_v54  ;;  %s1239_s19 = scalar_lea.vmem %s1172_s18, 256  ;;  %p1244_p1 = scmp.lt.s32.totalorder %s1172_s18, %s1172_s18 }
  0xdb   :  { %vm590_vm14 = vcmp.eq.s32.totalorder %v492_v44, 1  ;;  %vm589_vm15 = vcmp.eq.s32.totalorder %v489_v16, 1  ;;  %vm366_vm0 = vcmp.eq.s32.totalorder %v1727_v5, %v1641_v24  ;;  %vm365_vm1 = vcmp.eq.s32.totalorder %v1727_v5, %v1643_v25  ;;  %p1240_p0 = scmp.ne.s32.totalorder %s1172_s18, %s1239_s19  ;;  %p1245_p2 = scmp.lt.s32.totalorder %s1239_s19, %s1239_s19 }
  0xdc   :  { %v1011_v17 = vadd.f32 %v1010_v11, %v1009_v7  ;;  %v1089_v51 = vadd.f32 %v1088_v37, %v1087_v6  ;;  %vm1964_vm2 = vmand %vm362_vm4, %vm590_vm14  ;;  %v1971_v62 = vmul.f32 %v846_v58, %v846_v58  ;;  %v1973_v42 = vmul.f32 %v845_v1, %v845_v1 }
  0xdd   :  { %vm627_vm3 = vmand %vm361_vm5, %vm589_vm15  ;;  %v498_v49 = vpop.permute.xlu1 %497  ;;  %v495_v52 = vpop.permute.xlu0 %494  ;;  %v1975_v12 = vadd.s32 296, %v161_v9  ;;  %v847_v50 = vsub.f32 1.0, %v1949_v13  ;;  %v1012_v19 = vsel %vm80_vm6, %v892_v10, 0.0  ;;  %v1090_v44 = vsel %vm80_vm6, %v1199_v53, 0.0  ;;  %p1246_p3 = por %p1245_p2, %p1244_p1 }
  0xde   :  { %v893_v16 = vsel %vm627_vm3, %v1768_v60, 0.0  ;;  %v1200_v7 = vsel %vm627_vm3, 1.0, %v2433_v54  ;;  %v1013_v58 = vadd.f32 %v1012_v19, %v1011_v17  ;;  %v1091_v9 = vadd.f32 %v1090_v44, %v1089_v51 }
  0xdf   :  { %v1014_v1 = vsel %vm80_vm6, %v893_v16, 0.0  ;;  %v1092_v11 = vsel %vm80_vm6, %v1200_v7, 0.0  ;;  %v894_v6 = vsel %vm1964_vm2, %v1766_v59, 0.0  ;;  %v1201_v60 = vsel %vm1964_vm2, 1.0, %v2433_v54  ;;  %p1247_p4 = pnand %p1246_p3, %p1240_p0 }
  0xe0   :  { %vm592_vm4 = vcmp.eq.s32.totalorder %v498_v49, 1  ;;  %vm591_vm5 = vcmp.eq.s32.totalorder %v495_v52, 1  ;;  %vm368_vm8 = vcmp.eq.s32.totalorder %v1727_v5, %v1647_v26  ;;  %v1015_v37 = vadd.f32 %v1014_v1, %v1013_v58 }
  0xe1   :  { %v1093_v13 = vadd.f32 %v1092_v11, %v1091_v9  ;;  %vm2000_vm7 = vmand %vm364_vm11, %vm592_vm4  ;;  %v504_v53 = vpop.permute.xlu1 %503  ;;  %v501_v59 = vpop.permute.xlu0 %500  ;;  %v848_v17 = vsub.f32 1.0, %v1985_v20  ;;  %v1016_v22 = vsel %vm80_vm6, %v894_v6, 0.0  ;;  %v1094_v49 = vsel %vm80_vm6, %v1201_v60, 0.0 }
  0xe2   :  { %v896_v51 = vsel %vm2000_vm7, %v1780_v3, 0.0  ;;  %v1203_v45 = vsel %vm2000_vm7, 1.0, %v2433_v54  ;;  %vm629_vm9 = vmand %vm363_vm13, %vm591_vm5  ;;  %vm594_vm10 = vcmp.eq.s32.totalorder %v504_v53, 1  ;;  %vm593_vm11 = vcmp.eq.s32.totalorder %v501_v59, 1 }
  0xe3   :  { %v895_v52 = vsel %vm629_vm9, %v1782_v0, 0.0  ;;  %v1202_v19 = vsel %vm629_vm9, 1.0, %v2433_v54  ;;  %vm2021_vm12 = vmand %vm366_vm0, %vm594_vm10  ;;  %v1017_v44 = vadd.f32 %v1016_v22, %v1015_v37  ;;  %v1095_v16 = vadd.f32 %v1094_v49, %v1093_v13 }
  0xe4   :  { %v1018_v23 = vsel %vm80_vm6, %v895_v52, 0.0  ;;  %v1096_v7 = vsel %vm80_vm6, %v1202_v19, 0.0  ;;  %vm631_vm13 = vmand %vm365_vm1, %vm593_vm11  ;;  %v1020_v0 = vsel %vm80_vm6, %v896_v51, 0.0  ;;  %v1098_v58 = vsel %vm80_vm6, %v1203_v45, 0.0 }
  0xe5   :  { %v897_v24 = vsel %vm631_vm13, %v1798_v47, 0.0  ;;  %v1204_v1 = vsel %vm631_vm13, 1.0, %v2433_v54  ;;  %v510_v9 = vpop.permute.xlu1 %509  ;;  %v507_v11 = vpop.permute.xlu0 %506  ;;  %v1019_v6 = vadd.f32 %v1018_v23, %v1017_v44  ;;  %v1097_v60 = vadd.f32 %v1096_v7, %v1095_v16 }
  0xe6   :  { %v898_v37 = vsel %vm2021_vm12, %v1790_v8, 0.0  ;;  %v1205_v25 = vsel %vm2021_vm12, 1.0, %v2433_v54  ;;  %v1022_v13 = vsel %vm80_vm6, %v897_v24, 0.0  ;;  %v1100_v10 = vsel %vm80_vm6, %v1204_v1, 0.0 }
  0xe7   :  { %vm596_vm14 = vcmp.eq.s32.totalorder %v510_v9, 1  ;;  %vm595_vm15 = vcmp.eq.s32.totalorder %v507_v11, 1  ;;  %vm367_vm0 = vcmp.eq.s32.totalorder %v1727_v5, %v1649_v27  ;;  %v1021_v47 = vadd.f32 %v1020_v0, %v1019_v6 }
  0xe8   :  { %v1099_v53 = vadd.f32 %v1098_v58, %v1097_v60  ;;  %vm2047_vm1 = vmand %vm368_vm8, %vm596_vm14  ;;  %v2051_v59 = vmul.f32 %v847_v50, %v847_v50  ;;  %vm370_vm2 = vcmp.eq.s32.totalorder %v1727_v5, %v1651_v28  ;;  %vm369_vm3 = vcmp.eq.s32.totalorder %v1727_v5, %v1653_v29 }
  0xe9   :  { %v1024_v51 = vsel %vm80_vm6, %v898_v37, 0.0  ;;  %v1102_v27 = vsel %vm80_vm6, %v1205_v25, 0.0  ;;  %vm633_vm4 = vmand %vm367_vm0, %vm595_vm15  ;;  %v516_v45 = vpop.permute.xlu1 %515  ;;  %v513_v22 = vpop.permute.xlu0 %512  ;;  %v1023_v26 = vadd.f32 %v1022_v13, %v1021_v47  ;;  %v900_v50 = vsel %vm2047_vm1, %v1800_v48, 0.0 }
  0xea   :  { %v1101_v49 = vadd.f32 %v1100_v10, %v1099_v53  ;;  %v1207_v52 = vsel %vm2047_vm1, 1.0, %v2433_v54  ;;  %v899_v19 = vsel %vm633_vm4, %v1805_v56, 0.0  ;;  %v1206_v3 = vsel %vm633_vm4, 1.0, %v2433_v54 }
  0xeb   :  { %vm598_vm5 = vcmp.eq.s32.totalorder %v516_v45, 1  ;;  %vm597_vm8 = vcmp.eq.s32.totalorder %v513_v22, 1  ;;  %v1025_v44 = vadd.f32 %v1024_v51, %v1023_v26  ;;  %v1026_v23 = vsel %vm80_vm6, %v899_v19, 0.0 }
  0xec   :  { %v1103_v16 = vadd.f32 %v1102_v27, %v1101_v49  ;;  %v1104_v7 = vsel %vm80_vm6, %v1206_v3, 0.0  ;;  %vm2072_vm7 = vmand %vm370_vm2, %vm598_vm5  ;;  %vm372_vm9 = vcmp.eq.s32.totalorder %v1727_v5, %v1655_v30  ;;  %vm371_vm10 = vcmp.eq.s32.totalorder %v1727_v5, %v1657_v31 }
  0xed   :  { %v1028_v56 = vsel %vm80_vm6, %v900_v50, 0.0  ;;  %v1106_v0 = vsel %vm80_vm6, %v1207_v52, 0.0  ;;  %vm635_vm11 = vmand %vm369_vm3, %vm597_vm8  ;;  %v522_v58 = vpop.permute.xlu1 %521  ;;  %v519_v28 = vpop.permute.xlu0 %518  ;;  %v1027_v24 = vadd.f32 %v1026_v23, %v1025_v44  ;;  %v902_v9 = vsel %vm2072_vm7, %v1807_v57, 0.0 }
  0xee   :  { %v1105_v1 = vadd.f32 %v1104_v7, %v1103_v16  ;;  %v1209_v11 = vsel %vm2072_vm7, 1.0, %v2433_v54  ;;  %v901_v6 = vsel %vm635_vm11, %v1819_v2, 0.0  ;;  %v1208_v60 = vsel %vm635_vm11, 1.0, %v2433_v54 }
  0xef   :  { %vm600_vm12 = vcmp.eq.s32.totalorder %v522_v58, 1  ;;  %vm599_vm13 = vcmp.eq.s32.totalorder %v519_v28, 1  ;;  %v1029_v29 = vadd.f32 %v1028_v56, %v1027_v24  ;;  %v1030_v37 = vsel %vm80_vm6, %v901_v6, 0.0 }
  0xf0   :  { %v1107_v25 = vadd.f32 %v1106_v0, %v1105_v1  ;;  %v1108_v13 = vsel %vm80_vm6, %v1208_v60, 0.0  ;;  %vm2098_vm14 = vmand %vm372_vm9, %vm600_vm12  ;;  %vm374_vm15 = vcmp.eq.s32.totalorder %v1727_v5, %v1659_v32  ;;  %vm373_vm0 = vcmp.eq.s32.totalorder %v1727_v5, %v1661_v33 }
  0xf1   :  { %v1032_v2 = vsel %vm80_vm6, %v902_v9, 0.0  ;;  %v1110_v10 = vsel %vm80_vm6, %v1209_v11, 0.0  ;;  %vm637_vm1 = vmand %vm371_vm10, %vm599_vm13  ;;  %v528_v47 = vpop.permute.xlu1 %527  ;;  %v525_v30 = vpop.permute.xlu0 %524  ;;  %v1031_v53 = vadd.f32 %v1030_v37, %v1029_v29  ;;  %v904_v51 = vsel %vm2098_vm14, %v1821_v61, 0.0  ;;  %v2463_v61 = vld [vmem:[#allocation10_spill] sm:$0xff] }
  0xf2   :  { %v1109_v8 = vadd.f32 %v1108_v13, %v1107_v25  ;;  %v1211_v27 = vsel %vm2098_vm14, 1.0, %v2433_v54  ;;  %v903_v45 = vsel %vm637_vm1, %v1826_v18, 0.0  ;;  %v1210_v22 = vsel %vm637_vm1, 1.0, %v2433_v54 }
  0xf3   :  { %vm602_vm2 = vcmp.eq.s32.totalorder %v528_v47, 1  ;;  %vm601_vm3 = vcmp.eq.s32.totalorder %v525_v30, 1  ;;  %v1033_v31 = vadd.f32 %v1032_v2, %v1031_v53  ;;  %v1034_v26 = vsel %vm80_vm6, %v903_v45, 0.0  ;;  %v2459_v2 = vld [vmem:[#allocation8_spill] sm:$0xff] }
  0xf4   :  { %v1111_v49 = vadd.f32 %v1110_v10, %v1109_v8  ;;  %v1112_v50 = vsel %vm80_vm6, %v1210_v22, 0.0  ;;  %vm2124_vm4 = vmand %vm374_vm15, %vm602_vm2  ;;  %vm376_vm5 = vcmp.eq.s32.totalorder %v1727_v5, %v1663_v34  ;;  %vm375_vm8 = vcmp.eq.s32.totalorder %v1727_v5, %v1665_v35 }
  0xf5   :  { %v1036_v18 = vsel %vm80_vm6, %v904_v51, 0.0  ;;  %v1114_v52 = vsel %vm80_vm6, %v1211_v27, 0.0  ;;  %vm639_vm7 = vmand %vm373_vm0, %vm601_vm3  ;;  %v534_v19 = vpop.permute.xlu1 %533  ;;  %v531_v32 = vpop.permute.xlu0 %530  ;;  %v1035_v3 = vadd.f32 %v1034_v26, %v1033_v31  ;;  %v906_v23 = vsel %vm2124_vm4, %v1828_v39, 0.0  ;;  %v2467_v39 = vld [vmem:[#allocation12_spill] sm:$0xff] }
  0xf6   :  { %v1113_v44 = vadd.f32 %v1112_v50, %v1111_v49  ;;  %v1213_v16 = vsel %vm2124_vm4, 1.0, %v2433_v54  ;;  %v905_v7 = vsel %vm639_vm7, %v1830_v38, 0.0  ;;  %v1212_v48 = vsel %vm639_vm7, 1.0, %v2433_v54  ;;  %v2456_v38 = vld [vmem:[#allocation7_spill] sm:$0xff] }
  0xf7   :  { %vm604_vm9 = vcmp.eq.s32.totalorder %v534_v19, 1  ;;  %vm603_vm10 = vcmp.eq.s32.totalorder %v531_v32, 1  ;;  %v1037_v33 = vadd.f32 %v1036_v18, %v1035_v3  ;;  %v1038_v56 = vsel %vm80_vm6, %v905_v7, 0.0 }
  0xf8   :  { %v1115_v0 = vadd.f32 %v1114_v52, %v1113_v44  ;;  %v1116_v58 = vsel %vm80_vm6, %v1212_v48, 0.0  ;;  %vm2150_vm11 = vmand %vm376_vm5, %vm604_vm9  ;;  %vm378_vm12 = vcmp.eq.s32.totalorder %v1727_v5, %v1667_v36  ;;  %vm377_vm13 = vcmp.eq.s32.totalorder %v1727_v5, %v2456_v38 }
  0xf9   :  { %v1040_v28 = vsel %vm80_vm6, %v906_v23, 0.0  ;;  %v1118_v24 = vsel %vm80_vm6, %v1213_v16, 0.0  ;;  %vm641_vm14 = vmand %vm375_vm8, %vm603_vm10  ;;  %v540_v1 = vpop.permute.xlu1 %539  ;;  %v537_v34 = vpop.permute.xlu0 %536  ;;  %v1039_v9 = vadd.f32 %v1038_v56, %v1037_v33  ;;  %v908_v6 = vsel %vm2150_vm11, %v1832_v55, 0.0 }
  0xfa   :  { %v1117_v11 = vadd.f32 %v1116_v58, %v1115_v0  ;;  %v1215_v60 = vsel %vm2150_vm11, 1.0, %v2433_v54  ;;  %v907_v29 = vsel %vm641_vm14, %v1834_v63, 0.0  ;;  %v1214_v37 = vsel %vm641_vm14, 1.0, %v2433_v54  ;;  %v2460_v63 = vld [vmem:[#allocation9_spill] sm:$0xff] }
  0xfb   :  { %vm606_vm15 = vcmp.eq.s32.totalorder %v540_v1, 1  ;;  %vm605_vm0 = vcmp.eq.s32.totalorder %v537_v34, 1  ;;  %v1041_v35 = vadd.f32 %v1040_v28, %v1039_v9  ;;  %v1042_v25 = vsel %vm80_vm6, %v907_v29, 0.0  ;;  %v2470_v29 = vld [vmem:[#allocation23_spill] sm:$0xff] }
  0xfc   :  { %v1119_v13 = vadd.f32 %v1118_v24, %v1117_v11  ;;  %v1120_v57 = vsel %vm80_vm6, %v1214_v37, 0.0  ;;  %vm2176_vm1 = vmand %vm378_vm12, %vm606_vm15  ;;  %vm380_vm2 = vcmp.eq.s32.totalorder %v1727_v5, %v2459_v2  ;;  %vm379_vm3 = vcmp.eq.s32.totalorder %v1727_v5, %v2460_v63  ;;  %v2469_v11 = vld [vmem:[#allocation22_spill] sm:$0xff] }
  0xfd   :  { %v1044_v10 = vsel %vm80_vm6, %v908_v6, 0.0  ;;  %v1122_v47 = vsel %vm80_vm6, %v1215_v60, 0.0  ;;  %vm643_vm4 = vmand %vm377_vm13, %vm605_vm0  ;;  %v546_v30 = vpop.permute.xlu1 %545  ;;  %v543_v36 = vpop.permute.xlu0 %542  ;;  %v1043_v53 = vadd.f32 %v1042_v25, %v1041_v35  ;;  %v910_v51 = vsel %vm2176_vm1, %v1838_v14, 0.0  ;;  %v2473_v63 = vld [vmem:[#allocation14_spill] sm:$0xff] }
  0xfe   :  { %v1121_v8 = vadd.f32 %v1120_v57, %v1119_v13  ;;  %v1217_v27 = vsel %vm2176_vm1, 1.0, %v2433_v54  ;;  %v909_v45 = vsel %vm643_vm4, %v1840_v15, 0.0  ;;  %v1216_v22 = vsel %vm643_vm4, 1.0, %v2433_v54  ;;  %v2464_v15 = vld [vmem:[#allocation11_spill] sm:$0xff] }
  0xff   :  { %vm608_vm5 = vcmp.eq.s32.totalorder %v546_v30, 1  ;;  %vm607_vm8 = vcmp.eq.s32.totalorder %v543_v36, 1  ;;  %v1045_v31 = vadd.f32 %v1044_v10, %v1043_v53  ;;  %v1046_v26 = vsel %vm80_vm6, %v909_v45, 0.0  ;;  %v2474_v10 = vld [vmem:[#allocation15_spill] sm:$0xff] }
 0x100   :  { %v1123_v49 = vadd.f32 %v1122_v47, %v1121_v8  ;;  %v1124_v50 = vsel %vm80_vm6, %v1216_v22, 0.0  ;;  %vm2202_vm7 = vmand %vm380_vm2, %vm608_vm5  ;;  %vm382_vm9 = vcmp.eq.s32.totalorder %v1727_v5, %v2463_v61  ;;  %vm381_vm10 = vcmp.eq.s32.totalorder %v1727_v5, %v2464_v15 }
 0x101   :  { %v1048_v18 = vsel %vm80_vm6, %v910_v51, 0.0  ;;  %v1126_v52 = vsel %vm80_vm6, %v1217_v27, 0.0  ;;  %vm645_vm11 = vmand %vm379_vm3, %vm607_vm8  ;;  %v552_v19 = vpop.permute.xlu1 %551  ;;  %v549_v32 = vpop.permute.xlu0 %548  ;;  %v1047_v3 = vadd.f32 %v1046_v26, %v1045_v31  ;;  %v912_v23 = vsel %vm2202_vm7, %v1846_v43, 0.0  ;;  %v2475_v27 = vld [vmem:[#allocation24_spill] sm:$0xff]  ;;  %v2476_v31 = vld [vmem:[#allocation25_spill] sm:$0xff] }
 0x102   :  { %v1125_v44 = vadd.f32 %v1124_v50, %v1123_v49  ;;  %v1219_v16 = vsel %vm2202_vm7, 1.0, %v2433_v54  ;;  %v911_v7 = vsel %vm645_vm11, %v1848_v41, 0.0  ;;  %v1218_v48 = vsel %vm645_vm11, 1.0, %v2433_v54  ;;  %v2468_v41 = vld [vmem:[#allocation13_spill] sm:$0xff] }
 0x103   :  { %vm610_vm12 = vcmp.eq.s32.totalorder %v552_v19, 1  ;;  %vm609_vm13 = vcmp.eq.s32.totalorder %v549_v32, 1  ;;  %v1049_v33 = vadd.f32 %v1048_v18, %v1047_v3  ;;  %v1050_v56 = vsel %vm80_vm6, %v911_v7, 0.0  ;;  %v2480_v19 = vld [vmem:[#allocation17_spill] sm:$0xff] }
 0x104   :  { %v1127_v0 = vadd.f32 %v1126_v52, %v1125_v44  ;;  %v1128_v58 = vsel %vm80_vm6, %v1218_v48, 0.0  ;;  %vm2228_vm14 = vmand %vm382_vm9, %vm610_vm12  ;;  %vm384_vm15 = vcmp.eq.s32.totalorder %v1727_v5, %v2467_v39  ;;  %vm383_vm0 = vcmp.eq.s32.totalorder %v1727_v5, %v2468_v41  ;;  %v2479_v52 = vld [vmem:[#allocation16_spill] sm:$0xff] }
 0x105   :  { %v1052_v38 = vsel %vm80_vm6, %v912_v23, 0.0  ;;  %v1130_v28 = vsel %vm80_vm6, %v1219_v16, 0.0  ;;  %vm647_vm1 = vmand %vm381_vm10, %vm609_vm13  ;;  %v558_v24 = vpop.permute.xlu1 %557  ;;  %v555_v1 = vpop.permute.xlu0 %554  ;;  %v1051_v34 = vadd.f32 %v1050_v56, %v1049_v33  ;;  %v914_v6 = vsel %vm2228_vm14, %v2469_v11, 0.0 }
 0x106   :  { %v1129_v9 = vadd.f32 %v1128_v58, %v1127_v0  ;;  %v1221_v60 = vsel %vm2228_vm14, 1.0, %v2433_v54  ;;  %v913_v37 = vsel %vm647_vm1, %v2470_v29, 0.0  ;;  %v1220_v35 = vsel %vm647_vm1, 1.0, %v2433_v54 }
 0x107   :  { %vm612_vm2 = vcmp.eq.s32.totalorder %v558_v24, 1  ;;  %vm611_vm3 = vcmp.eq.s32.totalorder %v555_v1, 1  ;;  %v1053_v25 = vadd.f32 %v1052_v38, %v1051_v34  ;;  %v1054_v13 = vsel %vm80_vm6, %v913_v37, 0.0  ;;  %v2483_v38 = vld [vmem:[#allocation18_spill] sm:$0xff] }
 0x108   :  { %v1131_v57 = vadd.f32 %v1130_v28, %v1129_v9  ;;  %v1132_v55 = vsel %vm80_vm6, %v1220_v35, 0.0  ;;  %vm2254_vm4 = vmand %vm384_vm15, %vm612_vm2  ;;  %vm386_vm5 = vcmp.eq.s32.totalorder %v1727_v5, %v2473_v63  ;;  %vm385_vm8 = vcmp.eq.s32.totalorder %v1727_v5, %v2474_v10 }
 0x109   :  { %v1056_v47 = vsel %vm80_vm6, %v914_v6, 0.0  ;;  %v1134_v30 = vsel %vm80_vm6, %v1221_v60, 0.0  ;;  %vm649_vm7 = vmand %vm383_vm0, %vm611_vm3  ;;  %v564_v36 = vpop.permute.xlu1 %563  ;;  %v561_v53 = vpop.permute.xlu0 %560  ;;  %v1055_v8 = vadd.f32 %v1054_v13, %v1053_v25  ;;  %v916_v45 = vsel %vm2254_vm4, %v2475_v27, 0.0 }
 0x10a   :  { %v1133_v51 = vadd.f32 %v1132_v55, %v1131_v57  ;;  %v1223_v22 = vsel %vm2254_vm4, 1.0, %v2433_v54  ;;  %v915_v26 = vsel %vm649_vm7, %v2476_v31, 0.0  ;;  %v1222_v49 = vsel %vm649_vm7, 1.0, %v2433_v54  ;;  %v2487_v55 = vld [vmem:[#allocation20_spill] sm:$0xff] }
 0x10b   :  { %vm614_vm9 = vcmp.eq.s32.totalorder %v564_v36, 1  ;;  %vm613_vm10 = vcmp.eq.s32.totalorder %v561_v53, 1  ;;  %v1057_v50 = vadd.f32 %v1056_v47, %v1055_v8  ;;  %v1058_v14 = vsel %vm80_vm6, %v915_v26, 0.0 }
 0x10c   :  { %v1135_v61 = vadd.f32 %v1134_v30, %v1133_v51  ;;  %v1136_v15 = vsel %vm80_vm6, %v1222_v49, 0.0  ;;  %vm2280_vm11 = vmand %vm386_vm5, %vm614_vm9  ;;  %vm388_vm12 = vcmp.eq.s32.totalorder %v1727_v5, %v2479_v52  ;;  %vm387_vm13 = vcmp.eq.s32.totalorder %v1727_v5, %v2480_v19 }
 0x10d   :  { %v1060_v32 = vsel %vm80_vm6, %v916_v45, 0.0  ;;  %v1138_v3 = vsel %vm80_vm6, %v1223_v22, 0.0  ;;  %vm651_vm14 = vmand %vm385_vm8, %vm613_vm10  ;;  %v570_v44 = vpop.permute.xlu1 %569  ;;  %v567_v23 = vpop.permute.xlu0 %566  ;;  %v1059_v16 = vadd.f32 %v1058_v14, %v1057_v50  ;;  %v918_v48 = vsel %vm2280_vm11, %v1901_v46, 0.0 }
 0x10e   :  { %v1137_v7 = vadd.f32 %v1136_v15, %v1135_v61  ;;  %v1225_v33 = vsel %vm2280_vm11, 1.0, %v2433_v54  ;;  %vm696_vm15 = vcmp.lt.s32.totalorder %v1975_v12, 300  ;;  %v917_v56 = vsel %vm651_vm14, %v1926_v4, 0.0  ;;  %v2484_v4 = vld [vmem:[#allocation19_spill] sm:$0xff] }
 0x10f   :  { %v1224_v0 = vsel %vm651_vm14, 1.0, %v2433_v54  ;;  %vm616_vm0 = vcmp.eq.s32.totalorder %v570_v44, 1  ;;  %vm615_vm1 = vcmp.eq.s32.totalorder %v567_v23, 1  ;;  %v1061_v58 = vadd.f32 %v1060_v32, %v1059_v16  ;;  %v1001_v23 = vld [vmem:[#allocation2] sm:$0xff]  ;;  %v1080_v16 = vld [vmem:[#allocation3] sm:$0xff] }
 0x110   :  { %v1062_v43 = vsel %vm80_vm6, %v917_v56, 0.0  ;;  %v1139_v39 = vadd.f32 %v1138_v3, %v1137_v7  ;;  %v1140_v41 = vsel %vm80_vm6, %v1224_v0, 0.0  ;;  %vm2307_vm2 = vmand %vm388_vm12, %vm616_vm0  ;;  %vm390_vm3 = vcmp.eq.s32.totalorder %v1727_v5, %v2483_v38 }
 0x111   :  { %vm389_vm4 = vcmp.eq.s32.totalorder %v1727_v5, %v2484_v4  ;;  %v1064_v28 = vsel %vm80_vm6, %v918_v48, 0.0  ;;  %v1142_v24 = vsel %vm80_vm6, %v1225_v33, 0.0  ;;  %vm653_vm5 = vmand %vm387_vm13, %vm615_vm1  ;;  %v576_v1 = vpop.permute.xlu1 %575  ;;  %v573_v34 = vpop.permute.xlu0 %572  ;;  %v1063_v9 = vadd.f32 %v1062_v43, %v1061_v58 }
 0x112   :  { %v1141_v11 = vadd.f32 %v1140_v41, %v1139_v39  ;;  %v920_v6 = vsel %vm2307_vm2, %v1928_v21, 0.0  ;;  %v1227_v60 = vsel %vm2307_vm2, 1.0, %v2433_v54  ;;  %v919_v29 = vsel %vm653_vm5, %v1935_v40, 0.0 }
 0x113   :  { %v1226_v37 = vsel %vm653_vm5, 1.0, %v2433_v54  ;;  %vm618_vm8 = vcmp.eq.s32.totalorder %v576_v1, 1  ;;  %vm617_vm7 = vcmp.eq.s32.totalorder %v573_v34, 1  ;;  %v1065_v35 = vadd.f32 %v1064_v28, %v1063_v9 }
 0x114   :  { %v1066_v25 = vsel %vm80_vm6, %v919_v29, 0.0  ;;  %v1143_v13 = vadd.f32 %v1142_v24, %v1141_v11  ;;  %v1144_v57 = vsel %vm80_vm6, %v1226_v37, 0.0  ;;  %vm2333_vm9 = vmand %vm390_vm3, %vm618_vm8  ;;  %vm392_vm10 = vcmp.eq.s32.totalorder %v1727_v5, %v2487_v55 }
 0x115   :  { %v1068_v40 = vsel %vm80_vm6, %v920_v6, 0.0  ;;  %v1146_v2 = vsel %vm80_vm6, %v1227_v60, 0.0  ;;  %vm655_vm11 = vmand %vm389_vm4, %vm617_vm7  ;;  %v582_v63 = vpop.permute.xlu1 %581  ;;  %v886_v10 = vmul.f32 %v848_v17, %v848_v17  ;;  %v579_v47 = vpop.permute.xlu0 %578  ;;  %v1067_v30 = vadd.f32 %v1066_v25, %v1065_v35 }
 0x116   :  { %v1145_v36 = vadd.f32 %v1144_v57, %v1143_v13  ;;  %v922_v53 = vsel %vm2333_vm9, %v1971_v62, 0.0  ;;  %v1229_v8 = vsel %vm2333_vm9, 1.0, %v2433_v54  ;;  %v921_v51 = vsel %vm655_vm11, %v1973_v42, 0.0  ;;  %v2488_v62 = vld [vmem:[#allocation21_spill] sm:$0xff] }
 0x117   :  { %v1228_v27 = vsel %vm655_vm11, 1.0, %v2433_v54  ;;  %vm620_vm12 = vcmp.eq.s32.totalorder %v582_v63, 1  ;;  %vm619_vm13 = vcmp.eq.s32.totalorder %v579_v47, 1  ;;  %v1069_v20 = vadd.f32 %v1068_v40, %v1067_v30 }
 0x118   :  { %v1070_v17 = vsel %vm80_vm6, %v921_v51, 0.0  ;;  %v1147_v45 = vadd.f32 %v1146_v2, %v1145_v36  ;;  %v1148_v22 = vsel %vm80_vm6, %v1228_v27, 0.0  ;;  %vm658_vm14 = vmand %vm392_vm10, %vm620_vm12  ;;  %vm391_vm0 = vcmp.eq.s32.totalorder %v1727_v5, %v2488_v62 }
 0x119   :  { %vm810_vm1 = vmand %vm658_vm14, %vm696_vm15  ;;  %v1071_v42 = vadd.f32 %v1070_v17, %v1069_v20  ;;  %v1072_v50 = vsel %vm80_vm6, %v922_v53, 0.0  ;;  %v1150_v14 = vsel %vm80_vm6, %v1229_v8, 0.0 }
 0x11a   :  { %v1149_v31 = vadd.f32 %v1148_v22, %v1147_v45  ;;  %v924_v26 = vsel %vm810_vm1, %v886_v10, 0.0  ;;  %v1231_v49 = vsel %vm810_vm1, 1.0, %v2433_v54  ;;  %vm657_vm2 = vmand %vm391_vm0, %vm619_vm13 }
 0x11b   :  { %v923_v61 = vsel %vm657_vm2, %v2051_v59, 0.0  ;;  %v1230_v15 = vsel %vm657_vm2, 1.0, %v2433_v54  ;;  %v1073_v18 = vadd.f32 %v1072_v50, %v1071_v42  ;;  %v1076_v19 = vsel %vm80_vm6, %v924_v26, 0.0 }
 0x11c   :  { %v1074_v5 = vsel %vm80_vm6, %v923_v61, 0.0  ;;  %v1151_v52 = vadd.f32 %v1150_v14, %v1149_v31  ;;  %v1152_v12 = vsel %vm80_vm6, %v1230_v15, 0.0  ;;  %v1154_v32 = vsel %vm80_vm6, %v1231_v49, 0.0 }
 0x11d   :  { %v1075_v3 = vadd.f32 %v1074_v5, %v1073_v18 }
 0x11e   :  { %v1153_v44 = vadd.f32 %v1152_v12, %v1151_v52 }
 0x11f   :  { %v1077_v7 = vadd.f32 %v1076_v19, %v1075_v3 }
 0x120   :  { %v1155_v48 = vadd.f32 %v1154_v32, %v1153_v44 }
 0x121   :  { %v1078_v33 = vadd.f32 %v1077_v7, %v1001_v23 }
 0x122   :  { %v1156_v59 = vadd.f32 %v1155_v48, %v1080_v16 }
 0x123   :  { %1079 = vst.msk [vmem:[#allocation2] sm:$0xff] %vm80_vm6, %v1078_v33 }
 0x124   :  { %1157 = vst.msk [vmem:[#allocation3] sm:$0xff] %vm80_vm6, %v1156_v59 }
 0x12a   :  { %v1161_v54 = vld [vmem:[#allocation2] sm:$0xff] }
 0x12b   :  { %v1163_v56 = vld [vmem:[#allocation3] sm:$0xff]  ;;  %1162 = vst.msk [vmem:[#allocation4] sm:$0xff] %vm80_vm6, %v1161_v54 }
 0x12c   :  { %1165 = vst.msk [vmem:[#allocation4 + $0x8] sm:$0xff] %vm80_vm6, %v1163_v56 }
 0x12d   :  { %1250 = shalt.err (!%p1247_p4)
}
 0x12e   :  { %s1251_s22 = scalar_lea.hbm %s2391_s2, 256 }
 0x12f   :  { %p1252_p5 = scmp.ne.s32.totalorder %s2391_s2, %s1251_s22  ;;  %p1255_p6 = scmp.lt.u32.totalorder %s1251_s22, %s2391_s2 }
 0x131   :  { %p1257_p7 = pnand %p1255_p6, %p1252_p5 }
 0x133   :  { %1260 = shalt.err (!%p1257_p7)
}
 0x134   :  { %s1266_s27 = smov 128   ;;  %s1267_s28 = smov 8  }
 0x135   :  { %1177 = dma.vmem_to_hbm [thread:$0]  %s1172_s18, 256, %s2391_s2, [#allocation5], %s1266_s27, %s1266_s27, %s1267_s28  }
 0x136   :  { %1261 = dma.done.wait [#allocation5], 256  }
 0x137   :  { %1262 = vsyncadd [#allocation5], 4294967040 }
 0x138   :  { %1181 = vsyncpa [#allocation5], 1 }

</bundles_post_ra>
